<compile_context>
chip_gen: v7x
topology: tpu7x:2x2x1
jax: 0.10.0
libtpu: 0.0.40
codegen_flags: <defaults>
</compile_context>

<pallas_src>
import jax
import jax.numpy as jnp
from jax import lax
from jax.experimental import pallas as pl
from jax.experimental.pallas import tpu as pltpu

LANE = 128   # TPU lane width: output slab padded to this so the store is lane-dense
TM = 8       # batch tile (sublane multiple)


def _mlp_kernel(x_ref, g1_ref, b1_ref, w1_ref, g2_ref, b2_ref, w2_ref, o_ref):
    """One batch tile: LN1 -> Linear1 -> GELU(erf) -> LN2 -> Linear2 (O padded to 128)."""
    eps = jnp.float32(1e-5)
    x = x_ref[...]                                           # (TM, D1) f32

    # LayerNorm over D1 = channel * in_dim
    mu1 = jnp.mean(x, axis=-1, keepdims=True)
    var1 = jnp.mean(jnp.square(x - mu1), axis=-1, keepdims=True)
    xn = (x - mu1) * lax.rsqrt(var1 + eps)
    xn = xn * g1_ref[...] + b1_ref[...]                      # (1, D1) affine params

    # Linear1 (no bias): (TM, D1) @ (D1, H) -> (TM, H)   [MXU, f32 accumulate]
    h = jnp.dot(xn, w1_ref[...], preferred_element_type=jnp.float32)

    # Exact (erf-form) GELU == PyTorch nn.GELU() default
    h = 0.5 * h * (1.0 + lax.erf(h * jnp.float32(0.7071067811865476)))

    # LayerNorm over H = in_dim (H is NOT padded, so stats use the true divisor)
    mu2 = jnp.mean(h, axis=-1, keepdims=True)
    var2 = jnp.mean(jnp.square(h - mu2), axis=-1, keepdims=True)
    hn = (h - mu2) * lax.rsqrt(var2 + eps)
    hn = hn * g2_ref[...] + b2_ref[...]                      # (1, H)

    # Linear2 (no bias): (TM, H) @ (H, O_pad) -> (TM, O_pad)  -> lane-dense store
    o_ref[...] = jnp.dot(hn, w2_ref[...],
                         preferred_element_type=jnp.float32).astype(o_ref.dtype)


def mlp_forward(t, params):
    """t: (B, C, in_dim) float32.  params: dict of LN/Linear weights."""
    B = t.shape[0]
    x = t.reshape(B, -1)                                     # (B, C*in_dim)
    D1 = x.shape[1]
    H = params["w1"].shape[1]
    O = params["w2"].shape[1]

    # Pad batch to a tile multiple and output width to a full 128-lane slab.
    B_pad = -(-B // TM) * TM
    O_pad = -(-O // LANE) * LANE
    if B_pad != B:
        x = jnp.pad(x, ((0, B_pad - B), (0, 0)))             # zero rows, sliced off later
    w2 = params["w2"]
    if O_pad != O:
        w2 = jnp.pad(w2, ((0, 0), (0, O_pad - O)))           # zero columns, sliced off later

    g1 = params["ln1_w"].reshape(1, D1)
    b1 = params["ln1_b"].reshape(1, D1)
    g2 = params["ln2_w"].reshape(1, H)
    b2 = params["ln2_b"].reshape(1, H)

    n_tiles = B_pad // TM
    cost = pl.CostEstimate(
        flops=2 * B_pad * (D1 * H + H * O_pad),
        transcendentals=B_pad * H,                            # erf per hidden activation
        bytes_accessed=4 * (B_pad * D1 + D1 * H + H * O_pad
                            + B_pad * O_pad + 2 * D1 + 2 * H),
    )

    out = pl.pallas_call(
        _mlp_kernel,
        out_shape=jax.ShapeDtypeStruct((B_pad, O_pad), x.dtype),
        grid=(n_tiles,),
        in_specs=[
            pl.BlockSpec((TM, D1), lambda i: (i, 0)),         # activations: tiled over batch
            pl.BlockSpec((1, D1), lambda i: (0, 0)),          # LN1 gamma (resident)
            pl.BlockSpec((1, D1), lambda i: (0, 0)),          # LN1 beta  (resident)
            pl.BlockSpec((D1, H), lambda i: (0, 0)),          # W1        (resident)
            pl.BlockSpec((1, H), lambda i: (0, 0)),           # LN2 gamma (resident)
            pl.BlockSpec((1, H), lambda i: (0, 0)),           # LN2 beta  (resident)
            pl.BlockSpec((H, O_pad), lambda i: (0, 0)),       # W2 padded (resident)
        ],
        out_specs=pl.BlockSpec((TM, O_pad), lambda i: (i, 0)),
        compiler_params=pltpu.CompilerParams(
            dimension_semantics=("parallel",)),               # megacore sharding on v7x
        cost_estimate=cost,
    )(x, g1, b1, params["w1"], g2, b2, w2)

    return out[:B, :O]                                        # drop batch/lane padding


def mlp_reference(t, params):
    x = t.reshape(t.shape[0], -1).astype(jnp.float32)
    eps = 1e-5
    mu = jnp.mean(x, -1, keepdims=True)
    var = jnp.mean((x - mu) ** 2, -1, keepdims=True)
    xn = (x - mu) / jnp.sqrt(var + eps) * params["ln1_w"] + params["ln1_b"]
    h = xn @ params["w1"]
    h = 0.5 * h * (1.0 + lax.erf(h / jnp.sqrt(2.0)))
    mu2 = jnp.mean(h, -1, keepdims=True)
    var2 = jnp.mean((h - mu2) ** 2, -1, keepdims=True)
    hn = (h - mu2) / jnp.sqrt(var2 + eps) * params["ln2_w"] + params["ln2_b"]
    return hn @ params["w2"]


def init_params(key, channel, in_dim, out_dim):
    D1 = channel * in_dim
    k1, k2 = jax.random.split(key)
    # PyTorch defaults: LayerNorm weight=1, bias=0; Linear ~ U(-1/sqrt(fan_in), 1/sqrt(fan_in)).
    # Weights stored pre-transposed as (fan_in, fan_out) so the kernel does x @ W.
    w1 = jax.random.uniform(k1, (D1, in_dim), jnp.float32,
                            -1.0 / jnp.sqrt(D1), 1.0 / jnp.sqrt(D1))
    w2 = jax.random.uniform(k2, (in_dim, out_dim), jnp.float32,
                            -1.0 / jnp.sqrt(in_dim), 1.0 / jnp.sqrt(in_dim))
    return {
        "ln1_w": jnp.ones((D1,), jnp.float32),
        "ln1_b": jnp.zeros((D1,), jnp.float32),
        "w1": w1,
        "ln2_w": jnp.ones((in_dim,), jnp.float32),
        "ln2_b": jnp.zeros((in_dim,), jnp.float32),
        "w2": w2,
    }


if __name__ == "__main__":
    B, C, IN_DIM, OUT_DIM = 16, 4, 32, 16
    key = jax.random.PRNGKey(0)
    kx, kp = jax.random.split(key)
    t = jax.random.normal(kx, (B, C, IN_DIM), jnp.float32)
    params = init_params(kp, C, IN_DIM, OUT_DIM)

    out = jax.block_until_ready(mlp_forward(t, params))
    ref = mlp_reference(t, params)
    assert out.shape == (B, OUT_DIM)
    assert jnp.allclose(out, ref, atol=1e-4, rtol=1e-4)
    print("KERNEL_OK")
</pallas_src>

<mosaic_0001>
module attributes {stable_mosaic.version = 11 : i64} {
  func.func @_mlp_kernel(%arg0: i32, %arg1: memref<8x128xf32, #tpu.memory_space<vmem>>, %arg2: memref<1x128xf32, #tpu.memory_space<vmem>>, %arg3: memref<1x128xf32, #tpu.memory_space<vmem>>, %arg4: memref<128x32xf32, #tpu.memory_space<vmem>>, %arg5: memref<1x32xf32, #tpu.memory_space<vmem>>, %arg6: memref<1x32xf32, #tpu.memory_space<vmem>>, %arg7: memref<32x128xf32, #tpu.memory_space<vmem>>, %arg8: memref<8x128xf32, #tpu.memory_space<vmem>>) attributes {dimension_semantics = [#tpu.dimension_semantics<parallel>], iteration_bounds = array<i64: 2>, scalar_prefetch = 0 : i64, scratch_operands = 0 : i64, tpu.core_type = #tpu.core_type<tc>, window_params = [{transform_indices = @transform_0, window_bounds = array<i64: 8, 128>}, {pipeline_mode = #tpu.pipeline_mode<synchronous>, transform_indices = @transform_1, window_bounds = array<i64: 1, 128>}, {pipeline_mode = #tpu.pipeline_mode<synchronous>, transform_indices = @transform_2, window_bounds = array<i64: 1, 128>}, {pipeline_mode = #tpu.pipeline_mode<synchronous>, transform_indices = @transform_3, window_bounds = array<i64: 128, 32>}, {pipeline_mode = #tpu.pipeline_mode<synchronous>, transform_indices = @transform_4, window_bounds = array<i64: 1, 32>}, {pipeline_mode = #tpu.pipeline_mode<synchronous>, transform_indices = @transform_5, window_bounds = array<i64: 1, 32>}, {pipeline_mode = #tpu.pipeline_mode<synchronous>, transform_indices = @transform_6, window_bounds = array<i64: 32, 128>}, {transform_indices = @transform_7, window_bounds = array<i64: 8, 128>}]} {
    %c0 = arith.constant 0 : index
    %c0_0 = arith.constant 0 : index
    %0 = vector.load %arg1[%c0, %c0_0] : memref<8x128xf32, #tpu.memory_space<vmem>>, vector<8x128xf32>
    %cst = arith.constant dense<0.000000e+00> : vector<8xf32>
    %1 = vector.multi_reduction <add>, %0, %cst [1] : vector<8x128xf32> to vector<8xf32>
    %2 = vector.shape_cast %1 : vector<8xf32> to vector<8x1xf32>
    %cst_1 = arith.constant 1.280000e+02 : f32
    %3 = vector.broadcast %cst_1 : f32 to vector<8x1xf32>
    %4 = arith.divf %2, %3 : vector<8x1xf32>
    %5 = vector.broadcast %4 : vector<8x1xf32> to vector<8x128xf32>
    %6 = arith.subf %0, %5 : vector<8x128xf32>
    %7 = arith.mulf %6, %6 : vector<8x128xf32>
    %cst_2 = arith.constant dense<0.000000e+00> : vector<8xf32>
    %8 = vector.multi_reduction <add>, %7, %cst_2 [1] : vector<8x128xf32> to vector<8xf32>
    %9 = vector.shape_cast %8 : vector<8xf32> to vector<8x1xf32>
    %cst_3 = arith.constant 1.280000e+02 : f32
    %10 = vector.broadcast %cst_3 : f32 to vector<8x1xf32>
    %11 = arith.divf %9, %10 : vector<8x1xf32>
    %12 = vector.broadcast %4 : vector<8x1xf32> to vector<8x128xf32>
    %13 = arith.subf %0, %12 : vector<8x128xf32>
    %cst_4 = arith.constant 9.99999974E-6 : f32
    %14 = vector.broadcast %cst_4 : f32 to vector<8x1xf32>
    %15 = arith.addf %11, %14 : vector<8x1xf32>
    %16 = math.rsqrt %15 : vector<8x1xf32>
    %17 = vector.broadcast %16 : vector<8x1xf32> to vector<8x128xf32>
    %18 = arith.mulf %13, %17 : vector<8x128xf32>
    %c0_5 = arith.constant 0 : index
    %c0_6 = arith.constant 0 : index
    %19 = vector.load %arg2[%c0_5, %c0_6] : memref<1x128xf32, #tpu.memory_space<vmem>>, vector<1x128xf32>
    %20 = vector.broadcast %19 : vector<1x128xf32> to vector<8x128xf32>
    %21 = arith.mulf %18, %20 : vector<8x128xf32>
    %c0_7 = arith.constant 0 : index
    %c0_8 = arith.constant 0 : index
    %22 = vector.load %arg3[%c0_7, %c0_8] : memref<1x128xf32, #tpu.memory_space<vmem>>, vector<1x128xf32>
    %23 = vector.broadcast %22 : vector<1x128xf32> to vector<8x128xf32>
    %24 = arith.addf %21, %23 : vector<8x128xf32>
    %c0_9 = arith.constant 0 : index
    %c0_10 = arith.constant 0 : index
    %25 = vector.load %arg4[%c0_9, %c0_10] : memref<128x32xf32, #tpu.memory_space<vmem>>, vector<128x32xf32>
    %cst_11 = arith.constant dense<0.000000e+00> : vector<8x32xf32>
    %26 = tpu.matmul %24, %25, %cst_11 {dimension_numbers = #tpu.dot_dimension_numbers<[1], [0], [0], [1], [0, 0, 1, 1], [], []>} : vector<8x128xf32>, vector<128x32xf32>, vector<8x32xf32> -> vector<8x32xf32>
    %cst_12 = arith.constant 5.000000e-01 : f32
    %27 = vector.broadcast %cst_12 : f32 to vector<8x32xf32>
    %28 = arith.mulf %27, %26 : vector<8x32xf32>
    %cst_13 = arith.constant 0.707106769 : f32
    %29 = vector.broadcast %cst_13 : f32 to vector<8x32xf32>
    %30 = arith.mulf %26, %29 : vector<8x32xf32>
    %31 = math.erf %30 : vector<8x32xf32>
    %cst_14 = arith.constant 1.000000e+00 : f32
    %32 = vector.broadcast %cst_14 : f32 to vector<8x32xf32>
    %33 = arith.addf %32, %31 : vector<8x32xf32>
    %34 = arith.mulf %28, %33 : vector<8x32xf32>
    %cst_15 = arith.constant dense<0.000000e+00> : vector<8xf32>
    %35 = vector.multi_reduction <add>, %34, %cst_15 [1] : vector<8x32xf32> to vector<8xf32>
    %36 = vector.shape_cast %35 : vector<8xf32> to vector<8x1xf32>
    %cst_16 = arith.constant 3.200000e+01 : f32
    %37 = vector.broadcast %cst_16 : f32 to vector<8x1xf32>
    %38 = arith.divf %36, %37 : vector<8x1xf32>
    %39 = vector.broadcast %38 : vector<8x1xf32> to vector<8x32xf32>
    %40 = arith.subf %34, %39 : vector<8x32xf32>
    %41 = arith.mulf %40, %40 : vector<8x32xf32>
    %cst_17 = arith.constant dense<0.000000e+00> : vector<8xf32>
    %42 = vector.multi_reduction <add>, %41, %cst_17 [1] : vector<8x32xf32> to vector<8xf32>
    %43 = vector.shape_cast %42 : vector<8xf32> to vector<8x1xf32>
    %cst_18 = arith.constant 3.200000e+01 : f32
    %44 = vector.broadcast %cst_18 : f32 to vector<8x1xf32>
    %45 = arith.divf %43, %44 : vector<8x1xf32>
    %46 = vector.broadcast %38 : vector<8x1xf32> to vector<8x32xf32>
    %47 = arith.subf %34, %46 : vector<8x32xf32>
    %cst_19 = arith.constant 9.99999974E-6 : f32
    %48 = vector.broadcast %cst_19 : f32 to vector<8x1xf32>
    %49 = arith.addf %45, %48 : vector<8x1xf32>
    %50 = math.rsqrt %49 : vector<8x1xf32>
    %51 = vector.broadcast %50 : vector<8x1xf32> to vector<8x32xf32>
    %52 = arith.mulf %47, %51 : vector<8x32xf32>
    %c0_20 = arith.constant 0 : index
    %c0_21 = arith.constant 0 : index
    %53 = vector.load %arg5[%c0_20, %c0_21] : memref<1x32xf32, #tpu.memory_space<vmem>>, vector<1x32xf32>
    %54 = vector.broadcast %53 : vector<1x32xf32> to vector<8x32xf32>
    %55 = arith.mulf %52, %54 : vector<8x32xf32>
    %c0_22 = arith.constant 0 : index
    %c0_23 = arith.constant 0 : index
    %56 = vector.load %arg6[%c0_22, %c0_23] : memref<1x32xf32, #tpu.memory_space<vmem>>, vector<1x32xf32>
    %57 = vector.broadcast %56 : vector<1x32xf32> to vector<8x32xf32>
    %58 = arith.addf %55, %57 : vector<8x32xf32>
    %c0_24 = arith.constant 0 : index
    %c0_25 = arith.constant 0 : index
    %59 = vector.load %arg7[%c0_24, %c0_25] : memref<32x128xf32, #tpu.memory_space<vmem>>, vector<32x128xf32>
    %cst_26 = arith.constant dense<0.000000e+00> : vector<8x128xf32>
    %60 = tpu.matmul %58, %59, %cst_26 {dimension_numbers = #tpu.dot_dimension_numbers<[1], [0], [0], [1], [0, 0, 1, 1], [], []>} : vector<8x32xf32>, vector<32x128xf32>, vector<8x128xf32> -> vector<8x128xf32>
    %c0_27 = arith.constant 0 : index
    %c0_28 = arith.constant 0 : index
    %61 = vector.load %arg8[%c0_27, %c0_28] : memref<8x128xf32, #tpu.memory_space<vmem>>, vector<8x128xf32>
    tpu.vector_store %arg8[%c0_27, %c0_28], %60 {strides = array<i32>} : memref<8x128xf32, #tpu.memory_space<vmem>>, vector<8x128xf32>,
    return
  }
  func.func @transform_0(%arg0: i32) -> (i32, i32) {
    %c0_i32 = arith.constant 0 : i32
    %c0_i32_0 = arith.constant 0 : i32
    return %arg0, %c0_i32 : i32, i32
  }
  func.func @transform_1(%arg0: i32) -> (i32, i32) {
    %c0_i32 = arith.constant 0 : i32
    %c0_i32_0 = arith.constant 0 : i32
    %c0_i32_1 = arith.constant 0 : i32
    return %c0_i32, %c0_i32_0 : i32, i32
  }
  func.func @transform_2(%arg0: i32) -> (i32, i32) {
    %c0_i32 = arith.constant 0 : i32
    %c0_i32_0 = arith.constant 0 : i32
    %c0_i32_1 = arith.constant 0 : i32
    return %c0_i32, %c0_i32_0 : i32, i32
  }
  func.func @transform_3(%arg0: i32) -> (i32, i32) {
    %c0_i32 = arith.constant 0 : i32
    %c0_i32_0 = arith.constant 0 : i32
    %c0_i32_1 = arith.constant 0 : i32
    return %c0_i32, %c0_i32_0 : i32, i32
  }
  func.func @transform_4(%arg0: i32) -> (i32, i32) {
    %c0_i32 = arith.constant 0 : i32
    %c0_i32_0 = arith.constant 0 : i32
    %c0_i32_1 = arith.constant 0 : i32
    return %c0_i32, %c0_i32_0 : i32, i32
  }
  func.func @transform_5(%arg0: i32) -> (i32, i32) {
    %c0_i32 = arith.constant 0 : i32
    %c0_i32_0 = arith.constant 0 : i32
    %c0_i32_1 = arith.constant 0 : i32
    return %c0_i32, %c0_i32_0 : i32, i32
  }
  func.func @transform_6(%arg0: i32) -> (i32, i32) {
    %c0_i32 = arith.constant 0 : i32
    %c0_i32_0 = arith.constant 0 : i32
    %c0_i32_1 = arith.constant 0 : i32
    return %c0_i32, %c0_i32_0 : i32, i32
  }
  func.func @transform_7(%arg0: i32) -> (i32, i32) {
    %c0_i32 = arith.constant 0 : i32
    %c0_i32_0 = arith.constant 0 : i32
    return %arg0, %c0_i32 : i32, i32
  }
}

</mosaic_0001>

<bundles_post_ra>
// kernel: tpu_custom_call.1
= control target key start
LH: loop header
LB: loop body
LE: loop exit
PB: predicated region body
PF: predicated region fallthrough
CT: control target
= control target key end

     0   :  { %12 = vsyncpa [#allocation3], 0  ;;  %s1030_s0 = inlined_call_operand.vmem [shape: f32[16,128], index: 0, kind: input, shape index: {}]   ;;  %s1031_s1 = inlined_call_operand.vmem [shape: f32[1,128], index: 1, kind: input, shape index: {}]   ;;  %s1032_s2 = inlined_call_operand.vmem [shape: f32[1,128], index: 2, kind: input, shape index: {}]   ;;  %s1033_s3 = inlined_call_operand.vmem [shape: f32[128,32], index: 3, kind: input, shape index: {}]   ;;  %s1034_s4 = inlined_call_operand.vmem [shape: f32[1,32], index: 4, kind: input, shape index: {}]   ;;  %s1035_s5 = inlined_call_operand.vmem [shape: f32[1,32], index: 5, kind: input, shape index: {}]   ;;  %s1036_s6 = inlined_call_operand.vmem [shape: f32[32,128], index: 6, kind: input, shape index: {}]   ;;  %s1037_s7 = inlined_call_operand.hbm [shape: f32[16,128], index: 7, kind: output, shape index: {}]  }
   0x1   :  { %14 = vsyncpa [#allocation3 + $0x1], 0  ;;  %s845_s24 = smov 0   ;;  %s847_s25 = smov 0  }
   0x2   :  { %s849_s26 = smov 0   ;;  %s851_s27 = smov 0  }
   0x3 LB: > { %s866_s28 = sadd.s32 4294967295, %s799_s27   ;;  %s576_s29 = sadd.s32 4294967294, %s799_s27   ;;  %s799_s27 = sphi %s851_s27, %s1043_s27   ;;  %s795_s26 = sphi %s849_s26, %s1042_s26   ;;  %s791_s25 = sphi %s847_s25, %s1041_s25   ;;  %s787_s24 = sphi %s845_s24, %s1040_s24  }
   0x4   : > { %s870_s30 = sadd.s32 1, %s799_s27   ;;  %s179_s8 = sadd.s32 1, %s795_s26 }
   0x5   : > { %s176_s9 = ssub.s32 %s799_s27, %s870_s30  ;;  %p189_p0 = scmp.ne.s32.totalorder %s795_s26, %s791_s25 }
   0x6   : > { %p177_p1 = scmp.eq.s32.totalorder %s176_s9, 0  ;;  %p190_p2 = scmp.eq.s32.totalorder %s866_s28, 1 }
   0x7   : > { %p195_p3 = scmp.ne.s32.totalorder %s791_s25, %s787_s24  ;;  %p196_p4 = scmp.eq.s32.totalorder %s576_s29, 1 }
   0x8   : > { %s881_s10 = scalar_select %p177_p1, %s795_s26, %s179_s8  }
   0x9   : > { %p883_p5 = por %p190_p2, %p189_p0  ;;  %p887_p6 = por %p196_p4, %p195_p3 }
   0xa   : > { %p579_p7 = scmp.ge.s32.totalorder %s799_s27, 1  ;;  %p239_p8 = scmp.lt.s32.totalorder %s799_s27, 3 }
   0xc   : > { %p240_p9 = pnand %p579_p7, %p239_p8 }
   0xd   : > { %p270_p10 = scmp.lt.s32.totalorder (!%p240_p9), %s866_s28, 1  ;;  %v303_v1 = vld [vmem:[%s1033_s3] sm:$0xff] (!%p240_p9)  ;;  %v304_v2 = vld [vmem:[%s1033_s3 + $0x8] sm:$0xff] (!%p240_p9)  ;;  %v305_v3 = vld [vmem:[%s1033_s3 + $0x10] sm:$0xff] (!%p240_p9)  ;;  %v801_v4 = vmov (!%p240_p9), 0.0|0.0   ;;  %vm802_vm0 = vmmov (!%p240_p9), 0  }
   0xe   : > { %243 = sbr.rel (%p240_p9) target bundleno = 1105 (0x451), region = 48  ;;  %659 = vmatprep.subr.bf16.mxu0 (!%p240_p9), %v801_v4  ;;  %v660_v5 = vpack.c.bf16 (!%p240_p9), %v304_v2, %v303_v1  ;;  %v306_v6 = vld [vmem:[%s1033_s3 + $0x18] sm:$0xff] (!%p240_p9)  ;;  %683 = vmatprep.subr.bf16.mxu1 (!%p240_p9), %v801_v4  ;;  %v307_v8 = vld [vmem:[%s1033_s3 + $0x20] sm:$0xff] (!%p240_p9)  ;;  %v308_v9 = vld [vmem:[%s1033_s3 + $0x28] sm:$0xff] (!%p240_p9)  ;;  %v803_v23 = vmov (!%p240_p9), 0.0   ;;  %vm394_vm1 = vcmask (!%p240_p9), 261120  }
   0xf   : > { %v663_v7 = vpack.c.bf16 (!%p240_p9), %v306_v6, %v305_v3  ;;  %v666_v10 = vpack.c.bf16 (!%p240_p9), %v308_v9, %v307_v8  ;;  %v309_v15 = vld [vmem:[%s1033_s3 + $0x30] sm:$0xff] (!%p240_p9)  ;;  %v310_v16 = vld [vmem:[%s1033_s3 + $0x38] sm:$0xff] (!%p240_p9)  ;;  %v311_v18 = vld [vmem:[%s1033_s3 + $0x40] sm:$0xff] (!%p240_p9)  ;;  %645 = vmatprep.mubr.msk.f32.mxu0 (!%p240_p9), %vm802_vm0, %v803_v23  ;;  %656 = vmatprep.mubr.msk.f32.mxu1 (!%p240_p9), %vm802_vm0, %v803_v23  ;;  %s267_s29 = sand.u32 (!%p240_p9), 1, %s791_s25  }
  0x10   : > { %661 = vmatpush3.bf16.msra.mxu0 (!%p240_p9), %v660_v5  ;;  %v669_v17 = vpack.c.bf16 (!%p240_p9), %v310_v16, %v309_v15  ;;  %v312_v19 = vld [vmem:[%s1033_s3 + $0x48] sm:$0xff] (!%p240_p9)  ;;  %v313_v21 = vld [vmem:[%s1033_s3 + $0x50] sm:$0xff] (!%p240_p9)  ;;  %v314_v22 = vld [vmem:[%s1033_s3 + $0x58] sm:$0xff] (!%p240_p9)  ;;  %s580_s8 = sshll.u32 (!%p240_p9), %s267_s29, 3  ;;  %s504_s18 = scalar_lea.sflag (!%p240_p9), [#allocation3], %s267_s29 }
  0x11   : > { %662 = vmatprep.subr.bf16.mxu0 (!%p240_p9), %v801_v4  ;;  %v672_v20 = vpack.c.bf16 (!%p240_p9), %v312_v19, %v311_v18  ;;  %v675_v24 = vpack.c.bf16 (!%p240_p9), %v314_v22, %v313_v21  ;;  %v315_v25 = vld [vmem:[%s1033_s3 + $0x60] sm:$0xff] (!%p240_p9)  ;;  %v316_v26 = vld [vmem:[%s1033_s3 + $0x68] sm:$0xff] (!%p240_p9)  ;;  %v317_v28 = vld [vmem:[%s1033_s3 + $0x70] sm:$0xff] (!%p240_p9)  ;;  %s269_s9 = scalar_lea.vmem (!%p240_p9), [#allocation2], %s580_s8 }
  0x12   : > { %v678_v27 = vpack.c.bf16 (!%p240_p9), %v316_v26, %v315_v25  ;;  %v318_v29 = vld [vmem:[%s1033_s3 + $0x78] sm:$0xff] (!%p240_p9)  ;;  %v582_v35 = vld [vmem:[%s1031_s1] ss:$0 sm:$0xff] (!%p240_p9)  ;;  %v426_v54 = vld [vmem:[%s1036_s6 + $0x8] sm:$0xff] (!%p240_p9) }
  0x13   : > { %v681_v30 = vpack.c.bf16 (!%p240_p9), %v318_v29, %v317_v28  ;;  %v583_v37 = vld [vmem:[%s1032_s2] ss:$0 sm:$0xff] (!%p240_p9)  ;;  %v427_v55 = vld [vmem:[%s1036_s6 + $0x10] sm:$0xff] (!%p240_p9)  ;;  %v428_v57 = vld [vmem:[%s1036_s6 + $0x18] sm:$0xff] (!%p240_p9) }
  0x14   : > { %664 = vmatpush3.bf16.msra.mxu0 (!%p240_p9), %v663_v7  ;;  %v425_v53 = vld [vmem:[%s1036_s6] sm:$0xff] (!%p240_p9)  ;;  %v687_v58 = vpack.c.bf16 (!%p240_p9), %v428_v57, %v427_v55 }
  0x15   : > { %s271_s13 = scalar_select %p270_p10, %s866_s28, 1  ;;  %665 = vmatprep.subr.bf16.mxu0 %v801_v4  ;;  %v684_v56 = vpack.c.bf16 %v426_v54, %v425_v53  ;;  %v584_v63 = vld [vmem:[%s1034_s4] ss:$0 sm:$0xff] }
  0x16   : > { %v585_v1 = vld [vmem:[%s1035_s5] ss:$0 sm:$0xff] }
  0x17   : > { %s581_s14 = sshll.u32 %s271_s13, 3  ;;  %685 = vmatpush3.bf16.msra.mxu1 %v684_v56  ;;  %s517_s13 = sshll.u32 %s269_s9, 4  ;;  %s985_s13 = int_to_ptr.vmem [resolvable:$true] %s517_s13 }
  0x18   : > { %s273_s17 = scalar_lea.vmem %s1030_s0, %s581_s14  ;;  %667 = vmatpush3.bf16.msra.mxu0 %v666_v10  ;;  %686 = vmatprep.subr.bf16.mxu1 %v801_v4  ;;  %s588_s14 = sshll.u32 %s866_s28, 7 }
  0x19   : > { %v274_v0 = vld [vmem:[%s273_s17] sm:$0xff]  ;;  %668 = vmatprep.subr.bf16.mxu0 %v801_v4  ;;  %s990_s17 = scalar_lea.hbm %s1037_s7, %s588_s14  ;;  %s737_s19 = scalar_lea.vmem %s985_s13, 128 }
  0x1a   : > { %275 = vadd.xlane.f32.xlu0 %v274_v0  ;;  %p738_p11 = scmp.ne.s32.totalorder %s985_s13, %s737_s19  ;;  %s804_s28 = smov [#allocation2]  }
  0x1b   : > { %688 = vmatpush3.bf16.msra.mxu1 %v687_v58  ;;  %s741_s20 = sshll.u32 %s804_s28, 4  ;;  %s742_s20 = int_to_ptr.vmem [resolvable:$false] %s741_s20 }
  0x1c   : > { %670 = vmatpush3.bf16.msra.mxu0 %v669_v17  ;;  %p739_p12 = pnand %p738_p11, %p883_p5  ;;  %s743_s21 = scalar_lea.vmem %s742_s20, 256 }
  0x1d   : > { %671 = vmatprep.subr.bf16.mxu0 %v801_v4  ;;  %p744_p0 = scmp.lt.s32.totalorder %s985_s13, %s742_s20  ;;  %p745_p1 = scmp.lt.s32.totalorder %s743_s21, %s737_s19 }
  0x1e   : > { %p740_p13 = pneg %p739_p12 }
  0x1f   : > { %p746_p2 = por %p745_p1, %p744_p0 }
  0x20   : > { %673 = vmatpush3.bf16.msra.mxu0 %v672_v20 }
  0x21   : > { %674 = vmatprep.subr.bf16.mxu0 %v801_v4  ;;  %p747_p3 = pnand %p746_p2, %p740_p13 }
  0x24   : > { %676 = vmatpush3.bf16.msra.mxu0 %v675_v24 }
  0x25   : > { %677 = vmatprep.subr.bf16.mxu0 %v801_v4 }
  0x28   : > { %679 = vmatpush3.bf16.msra.mxu0 %v678_v27 }
  0x29   : > { %680 = vmatprep.subr.bf16.mxu0 %v801_v4 }
  0x2c   : > { %682 = vmatpush3.bf16.msra.mxu0 %v681_v30 }
  0xa7   : > { %v276_v11 = vpop.xlane.xlu0 %275 }
  0xa8   : > { %v278_v12 = vmul.f32 0.0078125, %v276_v11 }
  0xaa   : > { %v279_v13 = vsub.f32 %v274_v0, %v278_v12 }
  0xac   : > { %v280_v14 = vmul.f32 %v279_v13, %v279_v13 }
  0xae   : > { %281 = vadd.xlane.f32.xlu0 %v280_v14 }
 0x13b   : > { %v282_v31 = vpop.xlane.xlu0 %281 }
 0x13c   : > { %v283_v32 = vmul.f32 0.0078125, %v282_v31 }
 0x13e   : > { %v284_v33 = vadd.f32 1e-05, %v283_v32 }
 0x140   : > { %731 = vrsqrt.f32 %v284_v33 }
 0x14a   : > { %v732_v34 = vpop.eup %731 }
 0x14b   : > { %v286_v36 = vmul.f32 %v732_v34, %v279_v13 }
 0x14d   : > { %v294_v38 = vmul.f32 %v582_v35, %v286_v36 }
 0x14f   : > { %v302_v39 = vadd.f32 %v583_v37, %v294_v38 }
 0x151   : > { %646 = vmatmul.mubr.f32.vlgmr.msra.gmra.mrb[0].mxu0 %v302_v39 }
 0x224   : > { %v385_v40 = vpop.f32.mrb[0].mxu0 }
 0x225   : > { %v390_v41 = vmul.f32 0.70710677, %v385_v40  ;;  %v647_v42 = vpop.f32.mrb[1].mxu0  ;;  %v389_v44 = vmul.f32 0.5, %v385_v40 }
 0x227   : > { %733 = verf.f32 %v390_v41 }
 0x231   : > { %v734_v43 = vpop.eup %733 }
 0x232   : > { %v392_v45 = vadd.f32 1.0, %v734_v43 }
 0x234   : > { %v393_v46 = vmul.f32 %v392_v45, %v389_v44 }
 0x236   : > { %v395_v47 = vsel %vm394_vm1, %v393_v46, 0.0 }
 0x237   : > { %396 = vadd.xlane.f32.xlu1 %v395_v47 }
 0x2c4   : > { %v397_v48 = vpop.xlane.xlu1 %396 }
 0x2c5   : > { %v399_v49 = vmul.f32 0.03125, %v397_v48 }
 0x2c7   : > { %v400_v50 = vsub.f32 %v393_v46, %v399_v49 }
 0x2c9   : > { %v401_v51 = vmul.f32 %v400_v50, %v400_v50 }
 0x2cb   : > { %v402_v52 = vsel %vm394_vm1, %v401_v51, 0.0 }
 0x2cc   : > { %403 = vadd.xlane.f32.xlu1 %v402_v52 }
 0x359   : > { %v404_v59 = vpop.xlane.xlu1 %403 }
 0x35a   : > { %v405_v60 = vmul.f32 0.03125, %v404_v59 }
 0x35c   : > { %v406_v61 = vadd.f32 1e-05, %v405_v60 }
 0x35e   : > { %735 = vrsqrt.f32 %v406_v61 }
 0x368   : > { %v736_v62 = vpop.eup %735 }
 0x369   : > { %v408_v0 = vmul.f32 %v736_v62, %v400_v50 }
 0x36b   : > { %v416_v2 = vmul.f32 %v584_v63, %v408_v0 }
 0x36d   : > { %v424_v3 = vadd.f32 %v585_v1, %v416_v2 }
 0x36f   : > { %657 = vmatmul.mubr.msk.f32.vlgmr.msra.gmra.mrb[0].mxu1 %vm394_vm1, %v424_v3 }
 0x442   : > { %v498_v4 = vpop.f32.mrb[0].mxu1 }
 0x443   : > { %502 = vst [vmem:[%s269_s9] sm:$0xff] %v498_v4  ;;  %v658_v5 = vpop.f32.mrb[1].mxu1 }
 0x444   : > { %750 = shalt.err (!%p747_p3)
}
 0x445   : > { %s751_s22 = scalar_lea.hbm %s990_s17, 128  ;;  %s755_s8 = scalar_lea.hbm %s1037_s7, 256 }
 0x446   : > { %p752_p4 = scmp.ne.s32.totalorder %s990_s17, %s751_s22  ;;  %p756_p9 = scmp.lt.u32.totalorder %s990_s17, %s1037_s7 }
 0x447   : > { %p757_p10 = scmp.lt.u32.totalorder %s755_s8, %s751_s22  ;;  %p759_p12 = scmp.lt.u32.totalorder %s751_s22, %s990_s17 }
 0x448   : > { %p753_p7 = pnand %p752_p4, %p883_p5 }
 0x449   : > { %p758_p11 = por %p757_p10, %p756_p9 }
 0x44a   : > { %p754_p8 = pneg %p753_p7 }
 0x44b   : > { %p760_p13 = por %p759_p12, %p758_p11 }
 0x44d   : > { %p761_p0 = pnand %p760_p13, %p754_p8 }
 0x44f   : > { %764 = shalt.err (!%p761_p0)
}
 0x450   : > { %689 = dma.vmem_to_hbm [thread:$0]  (%p883_p5), %s985_s13, 128, %s990_s17, %s504_s18  }
 0x451 PF: > { %p695_p1 = scmp.ge.s32.totalorder %s799_s27, 2  ;;  %s529_s15 = sand.u32 1, %s787_s24  }
 0x452   : > { %s530_s16 = scalar_lea.sflag [#allocation3], %s529_s15 }
 0x453   : > { %p692_p2 = pnand %p695_p1, %p887_p6 }
 0x455   : > { %782 = dma.done.wait (!%p692_p2), %s530_s16, 128  }
 0x456   : > { %784 = vsyncadd (!%p692_p2), %s530_s16, 4294967168  ;;  %p17_p3 = scmp.ge.s32.totalorder %s870_s30, 4   ;;  %s1040_s24 = smov %s791_s25 }
 0x457   : > { %s1041_s25 = smov %s795_s26  ;;  %s1042_s26 = smov %s881_s10 }
 0x458   : > { %s1043_s27 = smov %s870_s30  ;;  %19 = sbr.rel (!%p17_p3) target bundleno = 3 (0x3), region = 83 }
 0x45f   :  { %535 = vsyncpa [#allocation3], 1 }
 0x460   :  { %537 = vsyncpa [#allocation3 + $0x1], 1 }

</bundles_post_ra>
